<compile_context>
chip_gen: v5e
topology: v5e:2x2
jax: 0.10.0
libtpu: 0.0.40
codegen_flags: <defaults>
</compile_context>

<pallas_src>
import jax
import jax.numpy as jnp
from jax import lax
from jax.experimental import pallas as pl
from jax.experimental.pallas import tpu as pltpu

_EPS = 1e-6
_MIB = 1024 * 1024
_CHUNK_ROWS = 256            # single-pass in-VMEM streaming chunk (mult. of 32)


# --------------------------------------------------------------------------
# helpers
# --------------------------------------------------------------------------
def _cdiv(a, b):
    return -(-a // b)


def _round_up(a, m):
    return _cdiv(a, m) * m


def _sublane_multiple(dtype):
    """Preferred sublane multiple: 8 (4-byte), 16 (2-byte), 32 (1-byte)."""
    return max(8, 32 // jnp.dtype(dtype).itemsize)


def _vmem_capacity_bytes():
    """Physical VMEM of the local TPU; device_kind-based fallback."""
    try:
        info = pltpu.get_tpu_info()
        cap = getattr(info, "vmem_capacity_bytes", None)
        if cap:
            return int(cap)
    except Exception:
        pass
    try:
        kind = jax.devices()[0].device_kind.lower()
    except Exception:
        kind = ""
    if "v7" in kind:
        return 64 * _MIB
    if any(t in kind for t in ("v6", "v5", "v4")):
        return 128 * _MIB
    if any(t in kind for t in ("v3", "v2")):
        return 16 * _MIB
    return 64 * _MIB           # conservative default


def _tensorcores_per_chip():
    """Best-effort TensorCore count per chip (1 on v5e/v6e, 2 on v7x)."""
    try:
        info = pltpu.get_tpu_info()
        for attr in ("tensorcores_per_chip", "num_tensorcores",
                     "cores_per_chip", "num_cores"):
            v = getattr(info, attr, None)
            if v:
                return max(1, min(2, int(v)))
    except Exception:
        pass
    try:
        if "v7" in jax.devices()[0].device_kind.lower():
            return 2
    except Exception:
        pass
    return 1


def _clamp_vmem(needed_bytes, cap_bytes):
    """Scoped-VMEM request: enough for the kernel, never above ~physical."""
    hi = int(cap_bytes * 0.85)
    lo = min(32 * _MIB, hi)
    return max(min(int(needed_bytes), hi), lo)


def _choose_tile_rows(s, max_rows, sub, min_tiles=1):
    """S-tile height (multiple of `sub`) and the padded S it implies."""
    max_rows = max(sub, (max_rows // sub) * sub)
    if min_tiles > 1 and s >= min_tiles * sub:
        max_rows = min(max_rows, max(sub, (s // min_tiles) // sub * sub))
    if s <= max_rows:
        return s, s
    # Prefer an exact divisor (no padding) if a reasonably large one exists.
    best = 0
    t = max_rows
    while t >= sub:
        if s % t == 0:
            best = t
            break
        t -= sub
    if best >= min(512, max_rows):
        return best, s
    # Otherwise keep tiles large and zero-pad a small tail.
    n_tiles = _cdiv(s, max_rows)
    tile = min(max_rows, _round_up(_cdiv(s, n_tiles), sub))
    return tile, _round_up(s, tile)


def _nx_from_sumsq(gsq):
    """(..., C) f32 sum-of-squares over spatial dims -> Nx, same shape."""
    gx = jnp.sqrt(gsq)
    gx_mean = jnp.mean(gx, axis=-1, keepdims=True)
    denom = gx_mean + _EPS
    inv = pl.reciprocal(denom, approx=True)       # EUP slot
    inv = inv * (2.0 - denom * inv)               # one Newton step -> ~f32
    return gx * inv


# --------------------------------------------------------------------------
# kernels
# --------------------------------------------------------------------------
def _make_single_pass_kernel(chunk_rows):
    """Single-pass kernel: x read once from HBM, reduction streamed in VMEM."""

    def kernel(x_ref, gamma_ref, beta_ref, o_ref):
        # x_ref/o_ref: (1, S, C) -- one full batch element.
        S, C = x_ref.shape[1], x_ref.shape[2]
        n_full = S // chunk_rows
        rem = S - n_full * chunk_rows

        def chunk_sumsq(start, rows):
            xc = x_ref[:, pl.ds(start, rows), :].astype(jnp.float32)
            return jnp.sum(xc * xc, axis=1, keepdims=True)        # (1,1,C)

        gsq = jnp.zeros((1, 1, C), jnp.float32)
        if n_full > 0:
            def body(i, acc):
                start = pl.multiple_of(i * chunk_rows, chunk_rows)
                return acc + chunk_sumsq(start, chunk_rows)
            gsq = lax.fori_loop(0, n_full, body, gsq)
        if rem > 0:
            gsq = gsq + chunk_sumsq(n_full * chunk_rows, rem)

        gamma = gamma_ref[...].astype(jnp.float32)[None]          # (1,1,C)
        beta = beta_ref[...].astype(jnp.float32)[None]            # (1,1,C)
        # gamma*(x*Nx) + beta + x  ==  x*(1 + gamma*Nx) + beta  (fused)
        scale = 1.0 + gamma * _nx_from_sumsq(gsq)                 # (1,1,C)

        def chunk_apply(start, rows):
            xc = x_ref[:, pl.ds(start, rows), :].astype(jnp.float32)
            o_ref[:, pl.ds(start, rows), :] = (
                xc * scale + beta).astype(o_ref.dtype)

        if n_full > 0:
            def body2(i, carry):
                start = pl.multiple_of(i * chunk_rows, chunk_rows)
                chunk_apply(start, chunk_rows)
                return carry
            lax.fori_loop(0, n_full, body2, 0)
        if rem > 0:
            chunk_apply(n_full * chunk_rows, rem)

    return kernel


def _grn_reduce_scale_kernel(x_ref, gamma_ref, scale_ref, gsq_acc):
    # x_ref: (1, tile_s1, C); scale_ref: (1,1,C) f32 output (written at the
    # finalize step); gsq_acc: (1,1,C) f32 VMEM scratch resident across the
    # "arbitrary" S axis.
    @pl.when(pl.program_id(1) == 0)
    def _():
        gsq_acc[...] = jnp.zeros_like(gsq_acc)

    x = x_ref[...].astype(jnp.float32)
    gsq_acc[...] += jnp.sum(x * x, axis=1, keepdims=True)

    @pl.when(pl.program_id(1) == pl.num_programs(1) - 1)
    def _():
        gamma = gamma_ref[...].astype(jnp.float32)[None]          # (1,1,C)
        scale_ref[...] = 1.0 + gamma * _nx_from_sumsq(gsq_acc[...])


def _grn_apply_kernel(x_ref, scale_ref, beta_ref, o_ref):
    # Pure elementwise epilogue: y = x*scale + beta (scale precomputed).
    x = x_ref[...].astype(jnp.float32)
    beta = beta_ref[...].astype(jnp.float32)[None]                # (1,1,C)
    o_ref[...] = (x * scale_ref[...] + beta).astype(o_ref.dtype)


# --------------------------------------------------------------------------
# wrapper
# --------------------------------------------------------------------------
def grn_pallas(x, gamma, beta, *, block_rows=None, donate_x=False):
    """GRN forward.  x: (B, D, H, W, C) channels-last; gamma, beta: (C,).

    block_rows: optional S-tile height override.  block_rows >= S forces the
                single-pass path; otherwise it must be a multiple of the
                dtype's sublane packing (8 f32 / 16 bf16 / 32 int8).
    donate_x:   alias x's HBM buffer to the output (only if x is dead after).
    """
    B, D, H, W, C = x.shape
    S = D * H * W
    itemsize = jnp.dtype(x.dtype).itemsize
    sub = _sublane_multiple(x.dtype)

    x2 = x.reshape(B, S, C)
    gamma2 = gamma.reshape(1, C)
    beta2 = beta.reshape(1, C)

    cap = _vmem_capacity_bytes()
    budget = int(cap * 0.7)          # headroom for compiler scratch/metadata
    tcs = _tensorcores_per_chip()

    slab_bytes = S * C * itemsize
    # Streamed reduction -> no full-slab f32 temp; 2x in + 2x out buffers.
    single_pass_live = 4 * slab_bytes + 8 * C * 4 + _MIB

    # On 2-TC chips (v7x) with B == 1, a (B,)-grid single pass leaves one core
    # idle; the two-pass apply grid is ("parallel","parallel") and uses both.
    prefer_two_pass = (tcs >= 2) and (B < tcs) and (S >= 2 * sub)

    if block_rows is not None:
        if block_rows >= S:
            use_single = True
        elif block_rows % sub != 0:
            raise ValueError(
                f"block_rows must be a multiple of {sub} for dtype {x.dtype}")
        else:
            use_single = False
    else:
        use_single = (single_pass_live <= budget) and not prefer_two_pass

    aliases = {0: 0} if donate_x else {}

    # ---------------- single-pass: per-batch slab, x read from HBM once ----
    if use_single:
        vmem_limit = _clamp_vmem(single_pass_live + 4 * _MIB, cap)
        out = pl.pallas_call(
            _make_single_pass_kernel(min(_CHUNK_ROWS, S)),
            out_shape=jax.ShapeDtypeStruct((B, S, C), x.dtype),
            grid_spec=pltpu.PrefetchScalarGridSpec(
                num_scalar_prefetch=0,
                grid=(B,),
                in_specs=[
                    pl.BlockSpec((1, S, C), lambda b: (b, 0, 0)),
                    pl.BlockSpec((1, C), lambda b: (0, 0)),
                    pl.BlockSpec((1, C), lambda b: (0, 0)),
                ],
                out_specs=pl.BlockSpec((1, S, C), lambda b: (b, 0, 0)),
            ),
            compiler_params=pltpu.CompilerParams(
                dimension_semantics=("parallel",),
                vmem_limit_bytes=vmem_limit),
            cost_estimate=pl.CostEstimate(
                flops=4 * B * S * C,
                transcendentals=2 * B * C,
                bytes_accessed=2 * B * S * C * itemsize + 2 * C * itemsize),
            input_output_aliases=aliases,
        )(x2, gamma2, beta2)
        return out.reshape(x.shape)

    # ---------------- two-pass: S-tiled reduce + finalize, then apply ------
    per_row_apply = 4 * C * itemsize                 # 2x in + 2x out buffers
    max_rows_apply = max(sub, budget // per_row_apply)
    if block_rows is not None:
        tile_s2 = block_rows
        s_pad = _round_up(S, tile_s2)
    else:
        tile_s2, s_pad = _choose_tile_rows(
            S, max_rows_apply, sub, min_tiles=2 if prefer_two_pass else 1)
    n_s2 = s_pad // tile_s2

    # Pass-1 (read-only) tiles can be bigger: largest multiple of the apply
    # tile that divides the padded S and fits a double-buffered input.
    max_rows_reduce = max(sub, budget // (2 * C * itemsize))
    k = 1
    for cand in range(n_s2, 0, -1):
        if n_s2 % cand == 0 and cand * tile_s2 <= max_rows_reduce:
            k = cand
            break
    tile_s1 = tile_s2 * k
    n_s1 = n_s2 // k

    if s_pad != S:
        # Zero padding leaves sum(x^2) unchanged; padded rows are sliced off.
        x2 = jnp.pad(x2, ((0, 0), (0, s_pad - S), (0, 0)))

    vmem1 = _clamp_vmem(2 * tile_s1 * C * itemsize + 16 * C * 4 + 4 * _MIB, cap)
    vmem2 = _clamp_vmem(4 * tile_s2 * C * itemsize + 16 * C * 4 + 4 * _MIB, cap)

    # Pass 1: per-(batch, channel) sum of squares + scale finalize.
    scale = pl.pallas_call(
        _grn_reduce_scale_kernel,
        out_shape=jax.ShapeDtypeStruct((B, 1, C), jnp.float32),
        grid_spec=pltpu.PrefetchScalarGridSpec(
            num_scalar_prefetch=0,
            grid=(B, n_s1),
            in_specs=[
                pl.BlockSpec((1, tile_s1, C), lambda b, s: (b, s, 0)),
                pl.BlockSpec((1, C), lambda b, s: (0, 0)),
            ],
            out_specs=pl.BlockSpec((1, 1, C), lambda b, s: (b, 0, 0)),
            scratch_shapes=[pltpu.VMEM((1, 1, C), jnp.float32)],
        ),
        compiler_params=pltpu.CompilerParams(
            dimension_semantics=("parallel", "arbitrary"),
            vmem_limit_bytes=vmem1),
        cost_estimate=pl.CostEstimate(
            flops=2 * B * s_pad * C,
            transcendentals=2 * B * C,
            bytes_accessed=B * s_pad * C * itemsize + B * C * 4),
    )(x2, gamma2)

    # Pass 2: pure elementwise apply; fully parallel grid (megacore friendly).
    out = pl.pallas_call(
        _grn_apply_kernel,
        out_shape=jax.ShapeDtypeStruct((B, s_pad, C), x.dtype),
        grid_spec=pltpu.PrefetchScalarGridSpec(
            num_scalar_prefetch=0,
            grid=(B, n_s2),
            in_specs=[
                pl.BlockSpec((1, tile_s2, C), lambda b, s: (b, s, 0)),
                pl.BlockSpec((1, 1, C), lambda b, s: (b, 0, 0)),
                pl.BlockSpec((1, C), lambda b, s: (0, 0)),
            ],
            out_specs=pl.BlockSpec((1, tile_s2, C), lambda b, s: (b, s, 0)),
        ),
        compiler_params=pltpu.CompilerParams(
            dimension_semantics=("parallel", "parallel"),
            vmem_limit_bytes=vmem2),
        cost_estimate=pl.CostEstimate(
            flops=2 * B * s_pad * C,
            transcendentals=0,
            bytes_accessed=2 * B * s_pad * C * itemsize + B * C * 4),
        input_output_aliases=aliases,
    )(x2, scale, beta2)

    if s_pad != S:
        out = out[:, :S, :]
    return out.reshape(x.shape)


# --------------------------------------------------------------------------
# pure-JAX reference mirroring the PyTorch module
# --------------------------------------------------------------------------
def grn_reference(x, gamma, beta):
    gx = jnp.sqrt(jnp.sum(x.astype(jnp.float32) ** 2,
                          axis=(1, 2, 3), keepdims=True))          # (B,1,1,1,C)
    nx = gx / (jnp.mean(gx, axis=-1, keepdims=True) + _EPS)
    g = gamma.reshape(1, 1, 1, 1, -1).astype(jnp.float32)
    b = beta.reshape(1, 1, 1, 1, -1).astype(jnp.float32)
    return (g * (x.astype(jnp.float32) * nx) + b
            + x.astype(jnp.float32)).astype(x.dtype)


if __name__ == "__main__":
    key = jax.random.PRNGKey(0)
    kx, kg, kb, kx2 = jax.random.split(key, 4)

    # Module initializes gamma/beta to zeros; use nonzero values so the
    # normalization path is actually exercised.
    C = 128
    gamma = jax.random.normal(kg, (C,), dtype=jnp.float32) * 0.1
    beta = jax.random.normal(kb, (C,), dtype=jnp.float32) * 0.1

    # Case 1: f32, lane-dense C, auto path (single-pass, streamed reduction).
    B, D, H, W = 2, 4, 16, 16
    x = jax.random.normal(kx, (B, D, H, W, C), dtype=jnp.float32)
    ref = grn_reference(x, gamma, beta)
    out = grn_pallas(x, gamma, beta)
    jax.block_until_ready(out)
    assert jnp.allclose(out, ref, atol=1e-4, rtol=1e-4), (
        float(jnp.max(jnp.abs(out - ref))))

    # Case 2: force the two-pass (S-tiled) path used for production shapes.
    out2 = grn_pallas(x, gamma, beta, block_rows=32)
    jax.block_until_ready(out2)
    assert jnp.allclose(out2, ref, atol=1e-4, rtol=1e-4), (
        float(jnp.max(jnp.abs(out2 - ref))))

    # Case 3: bf16, ragged S (needs padding), B=1 -> two-pass with a padded
    # tail and dtype-aware (16-row) sublane tiling.
    xr = jax.random.normal(kx2, (1, 2, 5, 7, C),
                           dtype=jnp.float32).astype(jnp.bfloat16)
    refr = grn_reference(xr, gamma, beta)
    outr = grn_pallas(xr, gamma, beta, block_rows=32)
    jax.block_until_ready(outr)
    assert jnp.allclose(outr.astype(jnp.float32), refr.astype(jnp.float32),
                        atol=2e-2, rtol=2e-2), (
        float(jnp.max(jnp.abs(outr.astype(jnp.float32)
                              - refr.astype(jnp.float32)))))

    # Case 4: f32 ragged S, forced single-pass (full-S block, tail-only chunk).
    x4 = xr.astype(jnp.float32)
    ref4 = grn_reference(x4, gamma, beta)
    out4 = grn_pallas(x4, gamma, beta, block_rows=2 * 5 * 7)
    jax.block_until_ready(out4)
    assert jnp.allclose(out4, ref4, atol=1e-4, rtol=1e-4), (
        float(jnp.max(jnp.abs(out4 - ref4))))

    print("KERNEL_OK")
</pallas_src>

<mosaic_0001>
module attributes {stable_mosaic.version = 11 : i64} {
  func.func @kernel(%arg0: i32, %arg1: memref<1x1024x128xf32, #tpu.memory_space<vmem>>, %arg2: memref<1x128xf32, #tpu.memory_space<vmem>>, %arg3: memref<1x128xf32, #tpu.memory_space<vmem>>, %arg4: memref<1x1024x128xf32, #tpu.memory_space<vmem>>) attributes {dimension_semantics = [#tpu.dimension_semantics<parallel>], iteration_bounds = array<i64: 2>, scalar_prefetch = 0 : i64, scratch_operands = 0 : i64, tpu.core_type = #tpu.core_type<tc>, window_params = [{transform_indices = @transform_0, window_bounds = array<i64: 1, 1024, 128>}, {pipeline_mode = #tpu.pipeline_mode<synchronous>, transform_indices = @transform_1, window_bounds = array<i64: 1, 128>}, {pipeline_mode = #tpu.pipeline_mode<synchronous>, transform_indices = @transform_2, window_bounds = array<i64: 1, 128>}, {transform_indices = @transform_3, window_bounds = array<i64: 1, 1024, 128>}]} {
    %cst = arith.constant 0.000000e+00 : f32
    %0 = vector.broadcast %cst : f32 to vector<1x1x128xf32>
    %c0_i32 = arith.constant 0 : i32
    %c4_i32 = arith.constant 4 : i32
    %1 = arith.addi %c0_i32, %c4_i32 : i32
    %c1_i32 = arith.constant 1 : i32
    %2 = scf.for %arg5 = %c0_i32 to %1 step %c1_i32 iter_args(%arg6 = %0) -> (vector<1x1x128xf32>)  : i32 {
      %c256_i32 = arith.constant 256 : i32
      %25 = arith.muli %arg5, %c256_i32 : i32
      %26 = tpu.assume_multiple %25, 256 : i32
      %c0_13 = arith.constant 0 : index
      %27 = arith.index_cast %26 : i32 to index
      %c0_14 = arith.constant 0 : index
      %28 = vector.load %arg1[%c0_13, %27, %c0_14] : memref<1x1024x128xf32, #tpu.memory_space<vmem>>, vector<1x256x128xf32>
      %29 = arith.mulf %28, %28 : vector<1x256x128xf32>
      %cst_15 = arith.constant dense<0.000000e+00> : vector<1x128xf32>
      %30 = vector.multi_reduction <add>, %29, %cst_15 [1] : vector<1x256x128xf32> to vector<1x128xf32>
      %31 = vector.shape_cast %30 : vector<1x128xf32> to vector<1x1x128xf32>
      %32 = arith.addf %arg6, %31 : vector<1x1x128xf32>
      scf.yield %32 : vector<1x1x128xf32>
    }
    %c4_i32_0 = arith.constant 4 : i32
    %c0 = arith.constant 0 : index
    %c0_1 = arith.constant 0 : index
    %3 = vector.load %arg2[%c0, %c0_1] : memref<1x128xf32, #tpu.memory_space<vmem>>, vector<1x128xf32>
    %4 = vector.shape_cast %3 : vector<1x128xf32> to vector<1x1x128xf32>
    %c0_2 = arith.constant 0 : index
    %c0_3 = arith.constant 0 : index
    %5 = vector.load %arg3[%c0_2, %c0_3] : memref<1x128xf32, #tpu.memory_space<vmem>>, vector<1x128xf32>
    %6 = vector.shape_cast %5 : vector<1x128xf32> to vector<1x1x128xf32>
    %7 = math.sqrt %2 : vector<1x1x128xf32>
    %cst_4 = arith.constant dense<0.000000e+00> : vector<1x1xf32>
    %8 = vector.multi_reduction <add>, %7, %cst_4 [2] : vector<1x1x128xf32> to vector<1x1xf32>
    %9 = vector.shape_cast %8 : vector<1x1xf32> to vector<1x1x1xf32>
    %cst_5 = arith.constant 1.280000e+02 : f32
    %10 = vector.broadcast %cst_5 : f32 to vector<1x1x1xf32>
    %11 = arith.divf %9, %10 : vector<1x1x1xf32>
    %cst_6 = arith.constant 9.99999997E-7 : f32
    %12 = vector.broadcast %cst_6 : f32 to vector<1x1x1xf32>
    %13 = arith.addf %11, %12 : vector<1x1x1xf32>
    %14 = tpu.reciprocal %13 {approx = true} : vector<1x1x1xf32> -> vector<1x1x1xf32>
    %15 = arith.mulf %13, %14 : vector<1x1x1xf32>
    %cst_7 = arith.constant 2.000000e+00 : f32
    %16 = vector.broadcast %cst_7 : f32 to vector<1x1x1xf32>
    %17 = arith.subf %16, %15 : vector<1x1x1xf32>
    %18 = arith.mulf %14, %17 : vector<1x1x1xf32>
    %19 = vector.broadcast %18 : vector<1x1x1xf32> to vector<1x1x128xf32>
    %20 = arith.mulf %7, %19 : vector<1x1x128xf32>
    %21 = arith.mulf %4, %20 : vector<1x1x128xf32>
    %cst_8 = arith.constant 1.000000e+00 : f32
    %22 = vector.broadcast %cst_8 : f32 to vector<1x1x128xf32>
    %23 = arith.addf %22, %21 : vector<1x1x128xf32>
    %c0_i32_9 = arith.constant 0 : i32
    %c4_i32_10 = arith.constant 4 : i32
    %24 = arith.addi %c0_i32_9, %c4_i32_10 : i32
    %c1_i32_11 = arith.constant 1 : i32
    scf.for %arg5 = %c0_i32_9 to %24 step %c1_i32_11  : i32 {
      %c256_i32 = arith.constant 256 : i32
      %25 = arith.muli %arg5, %c256_i32 : i32
      %26 = tpu.assume_multiple %25, 256 : i32
      %c0_13 = arith.constant 0 : index
      %27 = arith.index_cast %26 : i32 to index
      %c0_14 = arith.constant 0 : index
      %28 = vector.load %arg1[%c0_13, %27, %c0_14] : memref<1x1024x128xf32, #tpu.memory_space<vmem>>, vector<1x256x128xf32>
      %29 = vector.broadcast %23 : vector<1x1x128xf32> to vector<1x256x128xf32>
      %30 = arith.mulf %28, %29 : vector<1x256x128xf32>
      %31 = vector.broadcast %6 : vector<1x1x128xf32> to vector<1x256x128xf32>
      %32 = arith.addf %30, %31 : vector<1x256x128xf32>
      %c0_15 = arith.constant 0 : index
      %33 = arith.index_cast %26 : i32 to index
      %c0_16 = arith.constant 0 : index
      %34 = vector.load %arg4[%c0_15, %33, %c0_16] : memref<1x1024x128xf32, #tpu.memory_space<vmem>>, vector<1x256x128xf32>
      tpu.vector_store %arg4[%c0_15, %33, %c0_16], %32 {strides = array<i32>} : memref<1x1024x128xf32, #tpu.memory_space<vmem>>, vector<1x256x128xf32>,
    }
    %c4_i32_12 = arith.constant 4 : i32
    return
  }
  func.func @transform_0(%arg0: i32) -> (i32, i32, i32) {
    %c0_i32 = arith.constant 0 : i32
    %c0_i32_0 = arith.constant 0 : i32
    %c0_i32_1 = arith.constant 0 : i32
    return %arg0, %c0_i32, %c0_i32_0 : i32, i32, i32
  }
  func.func @transform_1(%arg0: i32) -> (i32, i32) {
    %c0_i32 = arith.constant 0 : i32
    %c0_i32_0 = arith.constant 0 : i32
    %c0_i32_1 = arith.constant 0 : i32
    return %c0_i32, %c0_i32_0 : i32, i32
  }
  func.func @transform_2(%arg0: i32) -> (i32, i32) {
    %c0_i32 = arith.constant 0 : i32
    %c0_i32_0 = arith.constant 0 : i32
    %c0_i32_1 = arith.constant 0 : i32
    return %c0_i32, %c0_i32_0 : i32, i32
  }
  func.func @transform_3(%arg0: i32) -> (i32, i32, i32) {
    %c0_i32 = arith.constant 0 : i32
    %c0_i32_0 = arith.constant 0 : i32
    %c0_i32_1 = arith.constant 0 : i32
    return %arg0, %c0_i32, %c0_i32_0 : i32, i32, i32
  }
}

</mosaic_0001>

<bundles_post_ra>
// kernel: tpu_custom_call.1
= control target key start
LH: loop header
LB: loop body
LE: loop exit
PB: predicated region body
PF: predicated region fallthrough
CT: control target
= control target key end

     0   :  { %8 = vsyncpa [#allocation3], 0  ;;  %s1259_s0 = inlined_call_operand.hbm [shape: f32[2,1024,128], index: 0, kind: input, shape index: {}]   ;;  %s1260_s1 = inlined_call_operand.hbm [shape: f32[1,128], index: 1, kind: input, shape index: {}]   ;;  %s1261_s2 = inlined_call_operand.vmem [shape: f32[1,128], index: 2, kind: input, shape index: {}]   ;;  %s1262_s3 = inlined_call_operand.hbm [shape: f32[2,1024,128], index: 3, kind: output, shape index: {}]  }
   0x1   :  { %10 = vsyncpa [#allocation3 + $0x1], 0 }
   0x2   :  { %11 = vsyncpa [#allocation6], 0 }
   0x3   :  { %12 = vsyncpa [#allocation4], 0 }
   0x4   :  { %14 = vsyncpa [#allocation4 + $0x1], 0  ;;  %s904_s12 = smov 0   ;;  %s906_s13 = smov 0  }
   0x5   :  { %s908_s14 = smov 0   ;;  %s910_s15 = smov 0  }
   0x6 LB: > { %s925_s16 = sadd.s32 4294967295, %s864_s15   ;;  %s610_s17 = sadd.s32 4294967294, %s864_s15   ;;  %s864_s15 = sphi %s910_s15, %s1274_s15   ;;  %s860_s14 = sphi %s908_s14, %s1273_s14   ;;  %s856_s13 = sphi %s906_s13, %s1272_s13   ;;  %s852_s12 = sphi %s904_s12, %s1271_s12  }
   0x7   : > { %s929_s18 = sadd.s32 1, %s864_s15   ;;  %s27_s19 = sadd.s32 1, %s860_s14 }
   0x8   : > { %s24_s20 = ssub.s32 %s864_s15, %s929_s18  ;;  %p34_p0 = scmp.ne.s32.totalorder %s860_s14, %s856_s13 }
   0x9   : > { %p25_p1 = scmp.eq.s32.totalorder %s24_s20, 0  ;;  %p35_p2 = scmp.eq.s32.totalorder %s864_s15, 0 }
   0xa   : > { %p40_p3 = scmp.ne.s32.totalorder %s856_s13, %s852_s12  ;;  %p41_p4 = scmp.eq.s32.totalorder %s925_s16, 0 }
   0xb   : > { %s941_s21 = scalar_select %p25_p1, %s860_s14, %s27_s19  }
   0xc   : > { %p943_p5 = por %p35_p2, %p34_p0  ;;  %p949_p6 = por %p41_p4, %p40_p3 }
   0xd   : > { %p106_p7 = scmp.eq.s32.totalorder %s925_s16, 1  ;;  %p112_p8 = scmp.eq.s32.totalorder %s610_s17, 1 }
   0xe   : > { %p611_p9 = scmp.ge.s32.totalorder %s864_s15, 1  ;;  %p119_p10 = scmp.lt.s32.totalorder %s864_s15, 3 }
   0xf   : > { %p956_p11 = por %p106_p7, %p34_p0  ;;  %p960_p12 = por %p112_p8, %p40_p3 }
  0x10   : > { %p964_p13 = pnand %p611_p9, %p119_p10  ;;  %s131_s29 = sshll.u32 %s1260_s1, 4  ;;  %s132_s29 = int_to_ptr.hbm [resolvable:$true] %s131_s29 }
  0x11   : > { %s878_s30 = smov [#allocation5]   ;;  %p651_p3 = scmp.lt.s32.totalorder %s864_s15, 2 }
  0x12   : > { %p638_p1 = pneg %p964_p13  ;;  %s133_s4 = sshll.u32 %s878_s30, 4  ;;  %s134_s4 = int_to_ptr.vmem [resolvable:$true] %s133_s4 }
  0x13   : > { %s147_s5 = sand.u32 1, %s860_s14   ;;  %p980_p7 = pnand %p651_p3, %p943_p5 }
  0x14   : > { %p639_p2 = pnand %p638_p1, %p41_p4  ;;  %s614_s7 = sshll.u32 %s147_s5, 10 }
  0x15   : > { %s628_s8 = sshll.u32 %s864_s15, 10  ;;  %s151_s19 = scalar_lea.vmem [#allocation2], %s614_s7 }
  0x16   : > { %641 = dma.hbm_to_vmem [thread:$0]  (!%p639_p2), %s132_s29, 16, %s134_s4, [#allocation6]  }
  0x17   : > { %s156_s11 = scalar_lea.hbm %s1259_s0, %s628_s8  ;;  %s159_s20 = sshll.u32 %s151_s19, 4  ;;  %s160_s20 = int_to_ptr.vmem [resolvable:$true] %s159_s20 }
  0x18   : > { %s157_s17 = sshll.u32 %s156_s11, 4  ;;  %s148_s27 = scalar_lea.sflag [#allocation3], %s147_s5  ;;  %s158_s17 = int_to_ptr.hbm [resolvable:$true] %s157_s17 }
  0x19   : > { %s752_s28 = sshra.s32 %s158_s17, 4  ;;  %p756_p8 = pneg %p980_p7  ;;  %s753_s28 = int_to_ptr.hbm [resolvable:$true] %s752_s28 }
  0x1a   : > { %s754_s22 = scalar_lea.hbm %s753_s28, 1024  ;;  %s759_s4 = scalar_lea.hbm %s1259_s0, 2048 }
  0x1b   : > { %p755_p5 = scmp.ne.s32.totalorder %s753_s28, %s754_s22  ;;  %p760_p1 = scmp.lt.s32.totalorder %s753_s28, %s1259_s0 }
  0x1c   : > { %p761_p2 = scmp.lt.s32.totalorder %s759_s4, %s754_s22 }
  0x1d   : > { %p757_p9 = pnand %p756_p8, %p755_p5 }
  0x1e   : > { %p762_p3 = por %p761_p2, %p760_p1 }
  0x1f   : > { %p758_p10 = pneg %p757_p9 }
  0x21   : > { %p763_p0 = pnand %p762_p3, %p758_p10 }
  0x23   : > { %766 = shalt.err (!%p763_p0)
}
  0x24   : > { %s879_s5 = smov 128   ;;  %s880_s7 = smov 8  }
  0x25   : > { %645 = dma.hbm_to_vmem [thread:$0]  (!%p980_p7), %s158_s17, 16384, %s160_s20, %s148_s27, %s879_s5, %s879_s5, %s880_s7  }
  0x26   : > { %171 = sbr.rel (%p964_p13) target bundleno = 329 (0x149), region = 32  ;;  %s1001_s10 = sand.u32 (!%p964_p13), 1, %s856_s13  }
  0x27   : > { %s618_s11 = sshll.u32 (!%p964_p13), %s1001_s10, 10  ;;  %s174_s19 = scalar_lea.sflag (!%p964_p13), [#allocation3], %s1001_s10 }
  0x28   : > { %s1005_s28 = scalar_lea.vmem (!%p964_p13), [#allocation2], %s618_s11 }
  0x2b   : > { %839 = dma.done.wait (%p949_p6), %s174_s19, 16384  }
  0x2c   : > { %841 = vsyncadd (%p949_p6), %s174_s19, 4294950912 }
  0x2d   : > { %843 = dma.done.wait (%p41_p4), [#allocation6], 16  }
  0x2e   : > { %845 = vsyncadd (%p41_p4), [#allocation6], 4294967280  ;;  %s1015_s26 = scalar_lea.vmem [#allocation7], %s618_s11  ;;  %v1017_v0 = vmov 0.0   ;;  %s1019_s6 = smov 0  }
  0x2f LB: >> { %s621_s23 = sshll.u32 %s872_s6, 8  ;;  %s211_s6 = sadd.s32 1, %s872_s6   ;;  %s872_s6 = sphi %s1019_s6, %s211_s6   ;;  %v868_v0 = vphi %v1017_v0, %v1269_v0  }
  0x30   : >> { %s1029_s17 = scalar_lea.vmem %s1005_s28, %s621_s23 [#allocation2]  ;;  %p208_p4 = scmp.ge.s32.totalorder %s211_s6, 4  }
  0x31   : >> { %v215_v1 = vld [vmem:[%s1029_s17] sm:$0xff]  ;;  %v216_v2 = vld [vmem:[%s1029_s17 + $0x8] sm:$0xff]  ;;  %v217_v3 = vld [vmem:[%s1029_s17 + $0x10] sm:$0xff]  ;;  %s1076_s22 = smov (%p208_p4), 0  }
  0x32   : >> { %v218_v4 = vld [vmem:[%s1029_s17 + $0x18] sm:$0xff]  ;;  %v247_v5 = vmul.f32 %v215_v1, %v215_v1  ;;  %v248_v6 = vmul.f32 %v216_v2, %v216_v2  ;;  %v249_v7 = vmul.f32 %v217_v3, %v217_v3  ;;  %v219_v8 = vld [vmem:[%s1029_s17 + $0x20] sm:$0xff]  ;;  %v220_v11 = vld [vmem:[%s1029_s17 + $0x28] sm:$0xff] }
  0x33   : >> { %v250_v9 = vmul.f32 %v218_v4, %v218_v4  ;;  %v251_v12 = vmul.f32 %v219_v8, %v219_v8  ;;  %v221_v14 = vld [vmem:[%s1029_s17 + $0x30] sm:$0xff]  ;;  %v252_v15 = vmul.f32 %v220_v11, %v220_v11  ;;  %v222_v17 = vld [vmem:[%s1029_s17 + $0x38] sm:$0xff]  ;;  %v223_v20 = vld [vmem:[%s1029_s17 + $0x40] sm:$0xff] }
  0x34   : >> { %v279_v10 = vadd.f32 %v248_v6, %v247_v5  ;;  %v253_v18 = vmul.f32 %v221_v14, %v221_v14  ;;  %v254_v21 = vmul.f32 %v222_v17, %v222_v17  ;;  %v224_v23 = vld [vmem:[%s1029_s17 + $0x48] sm:$0xff]  ;;  %v255_v24 = vmul.f32 %v223_v20, %v223_v20  ;;  %v225_v26 = vld [vmem:[%s1029_s17 + $0x50] sm:$0xff]  ;;  %v226_v29 = vld [vmem:[%s1029_s17 + $0x58] sm:$0xff] }
  0x35   : >> { %v256_v27 = vmul.f32 %v224_v23, %v224_v23  ;;  %v257_v30 = vmul.f32 %v225_v26, %v225_v26  ;;  %v227_v32 = vld [vmem:[%s1029_s17 + $0x60] sm:$0xff]  ;;  %v258_v33 = vmul.f32 %v226_v29, %v226_v29  ;;  %v228_v35 = vld [vmem:[%s1029_s17 + $0x68] sm:$0xff]  ;;  %v229_v38 = vld [vmem:[%s1029_s17 + $0x70] sm:$0xff] }
  0x36   : >> { %v280_v13 = vadd.f32 %v279_v10, %v249_v7  ;;  %v259_v36 = vmul.f32 %v227_v32, %v227_v32  ;;  %v260_v39 = vmul.f32 %v228_v35, %v228_v35  ;;  %v230_v41 = vld [vmem:[%s1029_s17 + $0x78] sm:$0xff]  ;;  %v261_v42 = vmul.f32 %v229_v38, %v229_v38  ;;  %v231_v44 = vld [vmem:[%s1029_s17 + $0x80] sm:$0xff]  ;;  %v232_v47 = vld [vmem:[%s1029_s17 + $0x88] sm:$0xff] }
  0x37   : >> { %v262_v45 = vmul.f32 %v230_v41, %v230_v41  ;;  %v263_v48 = vmul.f32 %v231_v44, %v231_v44  ;;  %v233_v50 = vld [vmem:[%s1029_s17 + $0x90] sm:$0xff]  ;;  %v264_v51 = vmul.f32 %v232_v47, %v232_v47  ;;  %v234_v53 = vld [vmem:[%s1029_s17 + $0x98] sm:$0xff]  ;;  %v235_v56 = vld [vmem:[%s1029_s17 + $0xa0] sm:$0xff] }
  0x38   : >> { %v281_v16 = vadd.f32 %v280_v13, %v250_v9  ;;  %v265_v54 = vmul.f32 %v233_v50, %v233_v50  ;;  %v266_v57 = vmul.f32 %v234_v53, %v234_v53  ;;  %v236_v59 = vld [vmem:[%s1029_s17 + $0xa8] sm:$0xff]  ;;  %v267_v60 = vmul.f32 %v235_v56, %v235_v56  ;;  %v237_v62 = vld [vmem:[%s1029_s17 + $0xb0] sm:$0xff]  ;;  %v238_v2 = vld [vmem:[%s1029_s17 + $0xb8] sm:$0xff] }
  0x39   : >> { %v268_v63 = vmul.f32 %v236_v59, %v236_v59  ;;  %v269_v3 = vmul.f32 %v237_v62, %v237_v62  ;;  %v239_v5 = vld [vmem:[%s1029_s17 + $0xc0] sm:$0xff]  ;;  %v270_v6 = vmul.f32 %v238_v2, %v238_v2  ;;  %v240_v8 = vld [vmem:[%s1029_s17 + $0xc8] sm:$0xff]  ;;  %v241_v11 = vld [vmem:[%s1029_s17 + $0xd0] sm:$0xff]  ;;  %v881_v50 = vmov (%p208_p4), 128.0  }
  0x3a   : >> { %v282_v19 = vadd.f32 %v281_v16, %v251_v12  ;;  %v271_v9 = vmul.f32 %v239_v5, %v239_v5  ;;  %v272_v12 = vmul.f32 %v240_v8, %v240_v8  ;;  %v242_v14 = vld [vmem:[%s1029_s17 + $0xd8] sm:$0xff]  ;;  %v243_v17 = vld [vmem:[%s1029_s17 + $0xe0] sm:$0xff]  ;;  %v244_v20 = vld [vmem:[%s1029_s17 + $0xe8] sm:$0xff] }
  0x3b   : >> { %v245_v23 = vld [vmem:[%s1029_s17 + $0xf0] sm:$0xff]  ;;  %v246_v26 = vld [vmem:[%s1029_s17 + $0xf8] sm:$0xff] }
  0x3c   : >> { %v283_v22 = vadd.f32 %v282_v19, %v252_v15  ;;  %v273_v15 = vmul.f32 %v241_v11, %v241_v11  ;;  %v278_v29 = vmul.f32 %v246_v26, %v246_v26 }
  0x3e   : >> { %v284_v25 = vadd.f32 %v283_v22, %v253_v18  ;;  %v274_v18 = vmul.f32 %v242_v14, %v242_v14 }
  0x40   : >> { %v285_v28 = vadd.f32 %v284_v25, %v254_v21  ;;  %v275_v21 = vmul.f32 %v243_v17, %v243_v17 }
  0x42   : >> { %v286_v31 = vadd.f32 %v285_v28, %v255_v24  ;;  %v276_v24 = vmul.f32 %v244_v20, %v244_v20 }
  0x44   : >> { %v287_v34 = vadd.f32 %v286_v31, %v256_v27  ;;  %v277_v27 = vmul.f32 %v245_v23, %v245_v23 }
  0x46   : >> { %v288_v37 = vadd.f32 %v287_v34, %v257_v30 }
  0x48   : >> { %v289_v40 = vadd.f32 %v288_v37, %v258_v33 }
  0x4a   : >> { %v290_v43 = vadd.f32 %v289_v40, %v259_v36  ;;  %v1072_v40 = vld [vmem:[%s1261_s2] sm:$0x1] (%p208_p4) }
  0x4c   : >> { %v291_v46 = vadd.f32 %v290_v43, %v260_v39 }
  0x4e   : >> { %v292_v49 = vadd.f32 %v291_v46, %v261_v42 }
  0x50   : >> { %v293_v52 = vadd.f32 %v292_v49, %v262_v45 }
  0x52   : >> { %v294_v55 = vadd.f32 %v293_v52, %v263_v48 }
  0x54   : >> { %v295_v58 = vadd.f32 %v294_v55, %v264_v51 }
  0x56   : >> { %v296_v61 = vadd.f32 %v295_v58, %v265_v54 }
  0x58   : >> { %v297_v1 = vadd.f32 %v296_v61, %v266_v57 }
  0x5a   : >> { %v298_v4 = vadd.f32 %v297_v1, %v267_v60  ;;  %v317_v1 = vld [vmem:[#allocation5] sm:$0x1] (%p208_p4) }
  0x5c   : >> { %v299_v7 = vadd.f32 %v298_v4, %v268_v63 }
  0x5e   : >> { %v300_v10 = vadd.f32 %v299_v7, %v269_v3 }
  0x60   : >> { %v301_v13 = vadd.f32 %v300_v10, %v270_v6 }
  0x62   : >> { %v302_v16 = vadd.f32 %v301_v13, %v271_v9 }
  0x64   : >> { %v303_v19 = vadd.f32 %v302_v16, %v272_v12 }
  0x66   : >> { %v304_v22 = vadd.f32 %v303_v19, %v273_v15 }
  0x68   : >> { %v305_v25 = vadd.f32 %v304_v22, %v274_v18 }
  0x6a   : >> { %v306_v28 = vadd.f32 %v305_v25, %v275_v21 }
  0x6c   : >> { %v307_v30 = vadd.f32 %v306_v28, %v276_v24 }
  0x6e   : >> { %v308_v31 = vadd.f32 %v307_v30, %v277_v27 }
  0x70   : >> { %v309_v32 = vadd.f32 %v308_v31, %v278_v29 }
  0x72   : >> { %v310_v33 = vrot.slane %v309_v32, 4 }
  0x74   : >> { %v311_v34 = vadd.f32 %v310_v33, %v309_v32 }
  0x76   : >> { %v312_v35 = vrot.slane %v311_v34, 2 }
  0x78   : >> { %v313_v36 = vadd.f32 %v312_v35, %v311_v34 }
  0x7a   : >> { %v314_v37 = vrot.slane %v313_v36, 1 }
  0x7c   : >> { %v315_v38 = vadd.f32 %v314_v37, %v313_v36  ;;  %210 = sbr.rel (!%p208_p4) target bundleno = 47 (0x2f), region = 98 }
  0x7e   : >> { %v316_v39 = vadd.f32 %v868_v0, %v315_v38  }
  0x80   : >> { %v1269_v0 = vmov %v316_v39  ;;  %716 = vrsqrt.f32 (%p208_p4), %v316_v39  ;;  %vm326_vm0 = vcmp.eq.f32.partialorder (%p208_p4), %v316_v39, inf  ;;  %v329_v46 = vand.u32 (%p208_p4), 2147483648, %v316_v39 }
  0x81   : > { %vm328_vm1 = vcmp.eq.f32.partialorder %v316_v39, 0.0  ;;  %718 = vrcp.f32 %v881_v50 }
  0x86   : > { %v717_v41 = vpop.eup %716 }
  0x87   : > { %v320_v42 = vmul.f32 %v717_v41, %v316_v39  ;;  %v719_v51 = vpop.eup %718 }
  0x88   : > { %v334_v52 = vmul.f32 128.0, %v719_v51  ;;  %vm338_vm2 = vweird.f32 %v719_v51 }
  0x89   : > { %v321_v43 = vmul.f32 %v717_v41, %v320_v42 }
  0x8a   : > { %v335_v53 = vsub.f32 1.0, %v334_v52 }
  0x8b   : > { %v322_v44 = vmul.f32 0.5, %v321_v43 }
  0x8c   : > { %v336_v54 = vmul.f32 %v719_v51, %v335_v53 }
  0x8d   : > { %v323_v45 = vsub.f32 1.5, %v322_v44 }
  0x8e   : > { %v337_v55 = vadd.f32 %v719_v51, %v336_v54 }
  0x8f   : > { %v324_v0 = vmul.f32 %v717_v41, %v323_v45 }
  0x90   : > { %v339_v56 = vsel %vm338_vm2, %v719_v51, %v337_v55 }
  0x91   : > { %v325_v47 = vmul.f32 %v324_v0, %v316_v39 }
  0x93   : > { %v327_v48 = vsel %vm326_vm0, %v316_v39, %v325_v47 }
  0x94   : > { %v330_v49 = vsel %vm328_vm1, %v329_v46, %v327_v48 }
  0x95   : > { %331 = vadd.xlane.f32.xlu0 %v330_v49 }
 0x108   : > { %v332_v57 = vpop.xlane.xlu0 %331 }
 0x109   : > { %v340_v58 = vmul.f32 %v339_v56, %v332_v57 }
 0x10b   : > { %v341_v59 = vadd.f32 1e-06, %v340_v58 }
 0x10d   : > { %720 = vrcp.f32 %v341_v59 }
 0x113   : > { %v721_v60 = vpop.eup %720 }
 0x114   : > { %v343_v61 = vmul.f32 %v721_v60, %v341_v59 }
 0x116   : > { %v344_v62 = vsub.f32 2.0, %v343_v61 }
 0x118   : > { %v345_v63 = vmul.f32 %v721_v60, %v344_v62 }
 0x11a   : > { %v346_v2 = vmul.f32 %v345_v63, %v330_v49 }
 0x11c   : > { %v347_v3 = vmul.f32 %v346_v2, %v317_v1 }
 0x11e   : > { %v1074_v4 = vadd.f32 1.0, %v347_v3 }
 0x11f LB: >> { %s622_s29 = sshll.u32 %s876_s22, 8  ;;  %v1089_v6 = vperm.slane %v1072_v40, 0  ;;  %s354_s22 = sadd.s32 1, %s876_s22   ;;  %s876_s22 = sphi %s1076_s22, %s354_s22  }
 0x120   : >> { %v1082_v5 = vperm.slane %v1074_v4, 0  ;;  %s1086_s30 = scalar_lea.vmem %s1005_s28, %s622_s29 [#allocation2]  ;;  %s1101_s4 = scalar_lea.vmem %s1015_s26, %s622_s29 [#allocation7] }
 0x121   : >> { %v357_v7 = vld [vmem:[%s1086_s30] sm:$0xff]  ;;  %v358_v8 = vld [vmem:[%s1086_s30 + $0x8] sm:$0xff]  ;;  %v359_v9 = vld [vmem:[%s1086_s30 + $0x10] sm:$0xff]  ;;  %p351_p6 = scmp.ge.s32.totalorder %s354_s22, 4  }
 0x122   : >> { %v392_v10 = vmul.f32 %v1082_v5, %v357_v7  ;;  %v393_v11 = vmul.f32 %v1082_v5, %v358_v8  ;;  %v394_v12 = vmul.f32 %v1082_v5, %v359_v9  ;;  %v360_v13 = vld [vmem:[%s1086_s30 + $0x18] sm:$0xff]  ;;  %v361_v14 = vld [vmem:[%s1086_s30 + $0x20] sm:$0xff]  ;;  %v362_v15 = vld [vmem:[%s1086_s30 + $0x28] sm:$0xff]  ;;  %s629_s9 = sshll.u32 (%p351_p6), %s925_s16, 10  ;;  %s505_s11 = sshll.u32 (%p351_p6), %s1015_s26, 4  ;;  %s506_s11 = int_to_ptr.vmem [resolvable:$true] %s505_s11 }
 0x123   : >> { %v395_v16 = vmul.f32 %v1082_v5, %v360_v13  ;;  %v396_v17 = vmul.f32 %v1082_v5, %v361_v14  ;;  %v397_v18 = vmul.f32 %v1082_v5, %v362_v15  ;;  %v363_v19 = vld [vmem:[%s1086_s30 + $0x30] sm:$0xff]  ;;  %v364_v20 = vld [vmem:[%s1086_s30 + $0x38] sm:$0xff]  ;;  %v365_v21 = vld [vmem:[%s1086_s30 + $0x40] sm:$0xff]  ;;  %s504_s7 = scalar_lea.hbm (%p351_p6), %s1262_s3, %s629_s9  ;;  %s493_s6 = scalar_lea.sflag (%p351_p6), [#allocation4], %s1001_s10 }
 0x124   : >> { %v427_v22 = vadd.f32 %v1089_v6, %v392_v10  ;;  %v428_v23 = vadd.f32 %v1089_v6, %v393_v11  ;;  %v429_v24 = vadd.f32 %v1089_v6, %v394_v12  ;;  %v398_v25 = vmul.f32 %v1082_v5, %v363_v19  ;;  %v366_v26 = vld [vmem:[%s1086_s30 + $0x48] sm:$0xff]  ;;  %v367_v29 = vld [vmem:[%s1086_s30 + $0x50] sm:$0xff]  ;;  %v368_v32 = vld [vmem:[%s1086_s30 + $0x58] sm:$0xff]  ;;  %s507_s19 = sshll.u32 (%p351_p6), %s504_s7, 4  ;;  %s802_s16 = scalar_lea.hbm (%p351_p6), %s1262_s3, 2048  ;;  %s508_s19 = int_to_ptr.hbm [resolvable:$true] %s507_s19 }
 0x125   : >> { %v430_v27 = vadd.f32 %v1089_v6, %v395_v16  ;;  %v399_v28 = vmul.f32 %v1082_v5, %v364_v20  ;;  %v431_v30 = vadd.f32 %v1089_v6, %v396_v17  ;;  %v400_v31 = vmul.f32 %v1082_v5, %v365_v21  ;;  %v369_v35 = vld [vmem:[%s1086_s30 + $0x60] sm:$0xff]  ;;  %v370_v38 = vld [vmem:[%s1086_s30 + $0x68] sm:$0xff]  ;;  %v371_v42 = vld [vmem:[%s1086_s30 + $0x70] sm:$0xff]  ;;  %s796_s23 = sshra.s32 (%p351_p6), %s508_s19, 4  ;;  %s797_s23 = int_to_ptr.hbm [resolvable:$true] %s796_s23 }
 0x126   : >> { %460 = vst [vmem:[%s1101_s4] sm:$0xff] %v427_v22  ;;  %v432_v33 = vadd.f32 %v1089_v6, %v397_v18  ;;  %v401_v34 = vmul.f32 %v1082_v5, %v366_v26  ;;  %v433_v36 = vadd.f32 %v1089_v6, %v398_v25  ;;  %v402_v37 = vmul.f32 %v1082_v5, %v367_v29  ;;  %v372_v45 = vld [vmem:[%s1086_s30 + $0x78] sm:$0xff]  ;;  %v373_v47 = vld [vmem:[%s1086_s30 + $0x80] sm:$0xff]  ;;  %v374_v50 = vld [vmem:[%s1086_s30 + $0x88] sm:$0xff]  ;;  %s798_s17 = scalar_lea.hbm (%p351_p6), %s797_s23, 1024  ;;  %p803_p5 = scmp.lt.s32.totalorder (%p351_p6), %s797_s23, %s1262_s3 }
 0x127   : >> { %461 = vst [vmem:[%s1101_s4 + $0x8] sm:$0xff] %v428_v23  ;;  %v434_v39 = vadd.f32 %v1089_v6, %v399_v28  ;;  %v403_v41 = vmul.f32 %v1082_v5, %v368_v32  ;;  %v435_v43 = vadd.f32 %v1089_v6, %v400_v31  ;;  %v404_v44 = vmul.f32 %v1082_v5, %v369_v35  ;;  %v375_v53 = vld [vmem:[%s1086_s30 + $0x90] sm:$0xff]  ;;  %v376_v56 = vld [vmem:[%s1086_s30 + $0x98] sm:$0xff]  ;;  %v377_v59 = vld [vmem:[%s1086_s30 + $0xa0] sm:$0xff]  ;;  %p799_p13 = scmp.ne.s32.totalorder (%p351_p6), %s797_s23, %s798_s17  ;;  %p804_p8 = scmp.lt.s32.totalorder (%p351_p6), %s802_s16, %s798_s17 }
 0x128   : >> { %462 = vst [vmem:[%s1101_s4 + $0x10] sm:$0xff] %v429_v24  ;;  %v436_v0 = vadd.f32 %v1089_v6, %v401_v34  ;;  %v405_v46 = vmul.f32 %v1082_v5, %v370_v38  ;;  %v437_v48 = vadd.f32 %v1089_v6, %v402_v37  ;;  %v406_v49 = vmul.f32 %v1082_v5, %v371_v42  ;;  %v378_v62 = vld [vmem:[%s1086_s30 + $0xa8] sm:$0xff]  ;;  %v379_v2 = vld [vmem:[%s1086_s30 + $0xb0] sm:$0xff]  ;;  %v380_v8 = vld [vmem:[%s1086_s30 + $0xb8] sm:$0xff] }
 0x129   : >> { %463 = vst [vmem:[%s1101_s4 + $0x18] sm:$0xff] %v430_v27  ;;  %v438_v51 = vadd.f32 %v1089_v6, %v403_v41  ;;  %v407_v52 = vmul.f32 %v1082_v5, %v372_v45  ;;  %v439_v54 = vadd.f32 %v1089_v6, %v404_v44  ;;  %v408_v55 = vmul.f32 %v1082_v5, %v373_v47  ;;  %v381_v11 = vld [vmem:[%s1086_s30 + $0xc0] sm:$0xff]  ;;  %v382_v14 = vld [vmem:[%s1086_s30 + $0xc8] sm:$0xff]  ;;  %v383_v17 = vld [vmem:[%s1086_s30 + $0xd0] sm:$0xff]  ;;  %p800_p0 = pnand (%p351_p6), %p799_p13, %p956_p11  ;;  %p805_p9 = por (%p351_p6), %p804_p8, %p803_p5 }
 0x12a   : >> { %464 = vst [vmem:[%s1101_s4 + $0x20] sm:$0xff] %v431_v30  ;;  %v440_v57 = vadd.f32 %v1089_v6, %v405_v46  ;;  %v409_v58 = vmul.f32 %v1082_v5, %v374_v50  ;;  %v441_v60 = vadd.f32 %v1089_v6, %v406_v49  ;;  %v410_v61 = vmul.f32 %v1082_v5, %v375_v53  ;;  %v384_v20 = vld [vmem:[%s1086_s30 + $0xd8] sm:$0xff]  ;;  %v385_v23 = vld [vmem:[%s1086_s30 + $0xe0] sm:$0xff]  ;;  %v386_v26 = vld [vmem:[%s1086_s30 + $0xe8] sm:$0xff] }
 0x12b   : >> { %465 = vst [vmem:[%s1101_s4 + $0x28] sm:$0xff] %v432_v33  ;;  %v442_v63 = vadd.f32 %v1089_v6, %v407_v52  ;;  %v411_v1 = vmul.f32 %v1082_v5, %v376_v56  ;;  %v443_v3 = vadd.f32 %v1089_v6, %v408_v55  ;;  %v412_v7 = vmul.f32 %v1082_v5, %v377_v59  ;;  %v387_v29 = vld [vmem:[%s1086_s30 + $0xf0] sm:$0xff]  ;;  %v388_v32 = vld [vmem:[%s1086_s30 + $0xf8] sm:$0xff]  ;;  %p801_p7 = pneg (%p351_p6), %p800_p0 }
 0x12c   : >> { %466 = vst [vmem:[%s1101_s4 + $0x30] sm:$0xff] %v433_v36  ;;  %v444_v9 = vadd.f32 %v1089_v6, %v409_v58  ;;  %v413_v10 = vmul.f32 %v1082_v5, %v378_v62  ;;  %v445_v12 = vadd.f32 %v1089_v6, %v410_v61  ;;  %v414_v13 = vmul.f32 %v1082_v5, %v379_v2 }
 0x12d   : >> { %467 = vst [vmem:[%s1101_s4 + $0x38] sm:$0xff] %v434_v39  ;;  %v446_v15 = vadd.f32 %v1089_v6, %v411_v1  ;;  %v415_v16 = vmul.f32 %v1082_v5, %v380_v8  ;;  %v447_v18 = vadd.f32 %v1089_v6, %v412_v7  ;;  %v416_v19 = vmul.f32 %v1082_v5, %v381_v11  ;;  %p806_p10 = pnand (%p351_p6), %p805_p9, %p801_p7 }
 0x12e   : >> { %468 = vst [vmem:[%s1101_s4 + $0x40] sm:$0xff] %v435_v43  ;;  %v448_v21 = vadd.f32 %v1089_v6, %v413_v10  ;;  %v417_v22 = vmul.f32 %v1082_v5, %v382_v14  ;;  %v449_v24 = vadd.f32 %v1089_v6, %v414_v13  ;;  %v418_v25 = vmul.f32 %v1082_v5, %v383_v17 }
 0x12f   : >> { %469 = vst [vmem:[%s1101_s4 + $0x48] sm:$0xff] %v436_v0  ;;  %v450_v27 = vadd.f32 %v1089_v6, %v415_v16  ;;  %v419_v28 = vmul.f32 %v1082_v5, %v384_v20  ;;  %v451_v30 = vadd.f32 %v1089_v6, %v416_v19  ;;  %v420_v31 = vmul.f32 %v1082_v5, %v385_v23 }
 0x130   : >> { %470 = vst [vmem:[%s1101_s4 + $0x50] sm:$0xff] %v437_v48  ;;  %v452_v33 = vadd.f32 %v1089_v6, %v417_v22  ;;  %v421_v34 = vmul.f32 %v1082_v5, %v386_v26  ;;  %v453_v35 = vadd.f32 %v1089_v6, %v418_v25  ;;  %v422_v36 = vmul.f32 %v1082_v5, %v387_v29 }
 0x131   : >> { %471 = vst [vmem:[%s1101_s4 + $0x58] sm:$0xff] %v438_v51  ;;  %v454_v37 = vadd.f32 %v1089_v6, %v419_v28  ;;  %v423_v38 = vmul.f32 %v1082_v5, %v388_v32  ;;  %v455_v39 = vadd.f32 %v1089_v6, %v420_v31 }
 0x132   : >> { %472 = vst [vmem:[%s1101_s4 + $0x60] sm:$0xff] %v439_v54  ;;  %v456_v41 = vadd.f32 %v1089_v6, %v421_v34  ;;  %v457_v42 = vadd.f32 %v1089_v6, %v422_v36 }
 0x133   : >> { %473 = vst [vmem:[%s1101_s4 + $0x68] sm:$0xff] %v440_v57  ;;  %v458_v43 = vadd.f32 %v1089_v6, %v423_v38 }
 0x134   : >> { %474 = vst [vmem:[%s1101_s4 + $0x70] sm:$0xff] %v441_v60 }
 0x135   : >> { %475 = vst [vmem:[%s1101_s4 + $0x78] sm:$0xff] %v442_v63 }
 0x136   : >> { %476 = vst [vmem:[%s1101_s4 + $0x80] sm:$0xff] %v443_v3 }
 0x137   : >> { %477 = vst [vmem:[%s1101_s4 + $0x88] sm:$0xff] %v444_v9 }
 0x138   : >> { %478 = vst [vmem:[%s1101_s4 + $0x90] sm:$0xff] %v445_v12 }
 0x139   : >> { %479 = vst [vmem:[%s1101_s4 + $0x98] sm:$0xff] %v446_v15 }
 0x13a   : >> { %480 = vst [vmem:[%s1101_s4 + $0xa0] sm:$0xff] %v447_v18 }
 0x13b   : >> { %481 = vst [vmem:[%s1101_s4 + $0xa8] sm:$0xff] %v448_v21 }
 0x13c   : >> { %482 = vst [vmem:[%s1101_s4 + $0xb0] sm:$0xff] %v449_v24 }
 0x13d   : >> { %483 = vst [vmem:[%s1101_s4 + $0xb8] sm:$0xff] %v450_v27 }
 0x13e   : >> { %484 = vst [vmem:[%s1101_s4 + $0xc0] sm:$0xff] %v451_v30 }
 0x13f   : >> { %485 = vst [vmem:[%s1101_s4 + $0xc8] sm:$0xff] %v452_v33 }
 0x140   : >> { %486 = vst [vmem:[%s1101_s4 + $0xd0] sm:$0xff] %v453_v35 }
 0x141   : >> { %487 = vst [vmem:[%s1101_s4 + $0xd8] sm:$0xff] %v454_v37  ;;  %353 = sbr.rel (!%p351_p6) target bundleno = 287 (0x11f), region = 109 }
 0x142   : >> { %488 = vst [vmem:[%s1101_s4 + $0xe0] sm:$0xff] %v455_v39 }
 0x143   : >> { %489 = vst [vmem:[%s1101_s4 + $0xe8] sm:$0xff] %v456_v41 }
 0x144   : >> { %490 = vst [vmem:[%s1101_s4 + $0xf0] sm:$0xff] %v457_v42 }
 0x145   : >> { %491 = vst [vmem:[%s1101_s4 + $0xf8] sm:$0xff] %v458_v43 }
 0x146   : > { %809 = shalt.err (!%p806_p10)
}
 0x147   : > { %s882_s10 = smov 128   ;;  %s883_s26 = smov 8  }
 0x148   : > { %636 = dma.vmem_to_hbm [thread:$0]  (%p956_p11), %s506_s11, 16384, %s508_s19, %s493_s6, %s882_s10, %s882_s10, %s883_s26  }
 0x149 PF: > { %s522_s29 = sand.u32 1, %s852_s12   ;;  %p1270_p1 = scmp.ge.s32.totalorder %s864_s15, 2 }
 0x14a   : > { %s523_s30 = scalar_lea.sflag [#allocation4], %s522_s29 }
 0x14b   : > { %p647_p2 = pnand %p1270_p1, %p960_p12 }
 0x14d   : > { %p648_p3 = pneg %p647_p2 }
 0x14f   : > { %847 = dma.done.wait (%p648_p3), %s523_s30, 16384  }
 0x150   : > { %849 = vsyncadd (%p648_p3), %s523_s30, 4294950912  ;;  %p17_p4 = scmp.ge.s32.totalorder %s929_s18, 4   ;;  %s1271_s12 = smov %s856_s13 }
 0x151   : > { %s1272_s13 = smov %s860_s14  ;;  %s1273_s14 = smov %s941_s21 }
 0x152   : > { %s1274_s15 = smov %s929_s18  ;;  %19 = sbr.rel (!%p17_p4) target bundleno = 6 (0x6), region = 120 }
 0x157   :  { %529 = vsyncpa [#allocation3], 1 }
 0x158   :  { %531 = vsyncpa [#allocation3 + $0x1], 1 }
 0x159   :  { %532 = vsyncpa [#allocation6], 1 }
 0x15a   :  { %533 = vsyncpa [#allocation4], 1 }
 0x15b   :  { %535 = vsyncpa [#allocation4 + $0x1], 1 }

</bundles_post_ra>
